<compile_context>
chip_gen: v7x
topology: tpu7x:2x2x1
jax: 0.10.0
libtpu: 0.0.40
codegen_flags: <defaults>
</compile_context>

<pallas_src>
import functools

import jax
import jax.numpy as jnp
from jax.experimental import pallas as pl
from jax.experimental.pallas import tpu as pltpu


# Whole-array-in-VMEM spec (no grid: a single kernel invocation sees the full tensors).
_VMEM = pl.BlockSpec(memory_space=pltpu.MemorySpace.VMEM)


def _gru_seq_kernel(gi_ref,      # (T, 3H)  precomputed input-gate activations: emb@Wih_e + ctx@Wih_c + b_ih
                    h0_ref,      # (1, H)   initial hidden state
                    whh_ref,     # (H, 3H)  recurrent weights, gate columns [r|z|n]
                    bhh_ref,     # (1, 3H)  recurrent bias
                    hseq_ref,    # out: (T, H) hidden state after every step
                    *, n_steps, hidden):
    """Sequential GRU recurrence only — everything not on the h_t -> h_{t+1} chain is hoisted."""
    H = hidden
    h = h0_ref[...]                                   # (1, H), carried in registers/VMEM
    whh = whh_ref[...]
    bhh = bhh_ref[...]
    # n_steps is a trace-time constant -> fully unrolled loop; per step the only MXU push on the
    # serial critical path is the (1,H)@(H,3H) recurrent matmul.
    for t in range(n_steps):
        gi = gi_ref[pl.ds(t, 1), :]                   # (1, 3H) static-row load
        gh = jnp.dot(h, whh, preferred_element_type=jnp.float32) + bhh
        r = jax.nn.sigmoid(gi[:, 0:H] + gh[:, 0:H])
        z = jax.nn.sigmoid(gi[:, H:2 * H] + gh[:, H:2 * H])
        n = jnp.tanh(gi[:, 2 * H:3 * H] + r * gh[:, 2 * H:3 * H])
        h = (1.0 - z) * n + z * h                     # (1, H)
        hseq_ref[pl.ds(t, 1), :] = h                  # static-row store


def _out_logsoftmax_kernel(hseq_ref,   # (T, H)  all per-step hidden states
                           wout_ref,   # (H, V)
                           bout_ref,   # (1, V)
                           logp_ref):  # out: (T, V) log-probabilities
    """Batched output projection + exact log_softmax over all decode steps at once."""
    logits = (jnp.dot(hseq_ref[...], wout_ref[...], preferred_element_type=jnp.float32)
              + bout_ref[...])
    m = jnp.max(logits, axis=1, keepdims=True)
    lse = jnp.log(jnp.sum(jnp.exp(logits - m), axis=1, keepdims=True)) + m
    logp_ref[...] = logits - lse


def init_params(key, hidden_size, output_size):
    H, V = hidden_size, output_size
    ks = jax.random.split(key, 10)
    s = 1.0 / jnp.sqrt(jnp.float32(H))
    u = lambda k, shape: jax.random.uniform(k, shape, jnp.float32, -s, s)
    return {
        "embedding": jax.random.normal(ks[0], (V, H), jnp.float32),
        # Attn('concat'): nn.Linear(2H, H) stored transposed -> (2H, H), plus score vector v.
        "W_attn": u(ks[1], (2 * H, H)),
        "b_attn": u(ks[2], (1, H)),     # cancels in the softmax (kept for parity with the module)
        "v_attn": u(ks[3], (1, H)),
        # GRU(2H -> H): weight_ih_l0.T -> (2H, 3H), weight_hh_l0.T -> (H, 3H); gate columns [r|z|n].
        "W_ih": u(ks[4], (2 * H, 3 * H)),
        "b_ih": u(ks[5], (1, 3 * H)),
        "W_hh": u(ks[6], (H, 3 * H)),
        "b_hh": u(ks[7], (1, 3 * H)),
        # out: Linear(H, V) stored transposed.
        "W_out": u(ks[8], (H, V)),
        "b_out": u(ks[9], (1, V)),
    }


@jax.jit
def bahdanau_attn_decoder_decode(tokens, last_hidden, encoder_outputs, params):
    """Run T decoder steps (teacher-forced token ids).

    tokens:          (T,) int32 token ids
    last_hidden:     (n_layers=1, 1, H) initial decoder hidden state
    encoder_outputs: (S, 1, H)
    returns (log_probs (T, V), hidden (1, 1, H), attn_weights (T, 1, 1, S))
    """
    H = params["W_hh"].shape[0]
    V = params["W_out"].shape[1]
    T = tokens.shape[0]
    S = encoder_outputs.shape[0]

    h0 = last_hidden[-1].reshape(1, H).astype(jnp.float32)
    enc = encoder_outputs[:, 0, :].astype(jnp.float32)                 # (S, H)

    # ---- Step-invariant Bahdanau ('concat', no tanh) attention, hoisted out of the recurrence ----
    # score_i = v.(W_h h) + v.(W_e enc_i) + v.b ; the h- and b-terms are constant over i and cancel
    # in the softmax, so the weights/context never depend on the decoder state (exact w.r.t. source).
    W_e = params["W_attn"][H:]                                         # (H, H)
    u_e = W_e @ params["v_attn"][0]                                    # (H,)
    attn_w = jax.nn.softmax(enc @ u_e)                                 # (S,)
    context = attn_w[None, :] @ enc                                    # (1, H)

    # ---- Precompute per-step input-gate activations as one batched matmul over T ----
    Wih_e = params["W_ih"][:H]                                         # (H, 3H)  embedded-input half
    Wih_c = params["W_ih"][H:]                                         # (H, 3H)  context half
    emb_all = params["embedding"][tokens].astype(jnp.float32)          # (T, H) ; dropout = identity (eval)
    gi_all = emb_all @ Wih_e + (context @ Wih_c + params["b_ih"])      # (T, 3H)

    # ---- Pallas kernel 1: the truly sequential GRU recurrence (single invocation, unrolled) ----
    hseq = pl.pallas_call(
        functools.partial(_gru_seq_kernel, n_steps=T, hidden=H),
        out_shape=jax.ShapeDtypeStruct((T, H), jnp.float32),
        in_specs=[_VMEM, _VMEM, _VMEM, _VMEM],
        out_specs=_VMEM,
    )(gi_all.astype(jnp.float32), h0,
      params["W_hh"].astype(jnp.float32), params["b_hh"].astype(jnp.float32))

    # ---- Pallas kernel 2: output projection + log_softmax batched over all T steps ----
    logp = pl.pallas_call(
        _out_logsoftmax_kernel,
        out_shape=jax.ShapeDtypeStruct((T, V), jnp.float32),
        in_specs=[_VMEM, _VMEM, _VMEM],
        out_specs=_VMEM,
    )(hseq, params["W_out"].astype(jnp.float32), params["b_out"].astype(jnp.float32))

    hidden_new = hseq[-1].reshape(1, 1, H)                             # (n_layers=1, 1, H)
    attn_weights = jnp.broadcast_to(attn_w[None, None, None, :], (T, 1, 1, S))
    return logp, hidden_new, attn_weights


def bahdanau_attn_decoder_step(word_input, last_hidden, encoder_outputs, params):
    """Single decode step with the original module's forward signature."""
    tokens = jnp.reshape(jnp.asarray(word_input, jnp.int32), (1,))
    log_probs, hidden, attn = bahdanau_attn_decoder_decode(
        tokens, last_hidden, encoder_outputs, params)
    return log_probs, hidden, attn[0]                                  # (1,V), (1,1,H), (1,1,S)


def _reference_decode(tokens, last_hidden, encoder_outputs, params):
    """Pure-JAX mirror of the per-step module semantics (numerical check only)."""
    H = params["W_hh"].shape[0]
    h = last_hidden[-1].reshape(1, H)
    enc = encoder_outputs[:, 0, :]
    S = enc.shape[0]
    outs, attns = [], []
    for t in range(int(tokens.shape[0])):
        emb = params["embedding"][tokens[t]].reshape(1, H)
        h_b = jnp.broadcast_to(h, (S, H))
        energy = jnp.concatenate([h_b, enc], axis=1) @ params["W_attn"] + params["b_attn"]
        scores = jnp.sum(energy * params["v_attn"], axis=1)            # (S,)
        w = jax.nn.softmax(scores)[None, :]                            # (1, S)
        context = w @ enc                                              # (1, H)
        x = jnp.concatenate([emb, context], axis=1)                    # (1, 2H)
        gi = x @ params["W_ih"] + params["b_ih"]
        gh = h @ params["W_hh"] + params["b_hh"]
        r = jax.nn.sigmoid(gi[:, :H] + gh[:, :H])
        z = jax.nn.sigmoid(gi[:, H:2 * H] + gh[:, H:2 * H])
        n = jnp.tanh(gi[:, 2 * H:] + r * gh[:, 2 * H:])
        h = (1.0 - z) * n + z * h
        logits = h @ params["W_out"] + params["b_out"]
        outs.append(jax.nn.log_softmax(logits, axis=1))
        attns.append(w)
    return (jnp.concatenate(outs, axis=0), h.reshape(1, 1, H),
            jnp.stack(attns)[:, None, :, :])


if __name__ == "__main__":
    jax.config.update("jax_default_matmul_precision", "highest")

    HIDDEN = 32      # hidden_size
    VOCAB = 64       # output_size
    SEQ = 10         # MAX_LENGTH
    STEPS = 6        # decode steps

    key = jax.random.PRNGKey(0)
    k_par, k_hid, k_enc, k_tok = jax.random.split(key, 4)

    params = init_params(k_par, HIDDEN, VOCAB)
    tokens = jax.random.randint(k_tok, (STEPS,), 0, VOCAB, dtype=jnp.int32)
    last_hidden = jax.random.normal(k_hid, (1, 1, HIDDEN), jnp.float32)
    encoder_outputs = jax.random.normal(k_enc, (SEQ, 1, HIDDEN), jnp.float32)

    log_probs, hidden, attn_weights = bahdanau_attn_decoder_decode(
        tokens, last_hidden, encoder_outputs, params)
    jax.block_until_ready((log_probs, hidden, attn_weights))

    assert log_probs.shape == (STEPS, VOCAB)
    assert hidden.shape == (1, 1, HIDDEN)
    assert attn_weights.shape == (STEPS, 1, 1, SEQ)
    # invariants: each row is a log-probability distribution; attention rows normalize to 1 (exact softmax)
    assert jnp.allclose(jnp.sum(jnp.exp(log_probs), axis=1), 1.0, atol=1e-3)
    assert jnp.allclose(jnp.sum(attn_weights, axis=-1), 1.0, atol=1e-4)

    # numerical check against a pure-JAX reference of the same per-step math
    ref_lp, ref_h, ref_aw = _reference_decode(tokens, last_hidden, encoder_outputs, params)
    assert jnp.allclose(log_probs, ref_lp, atol=1e-2, rtol=1e-2)
    assert jnp.allclose(hidden, ref_h, atol=1e-2, rtol=1e-2)
    assert jnp.allclose(attn_weights, ref_aw, atol=1e-3, rtol=1e-3)

    # single-step API parity with the PyTorch forward (word_input, last_hidden, encoder_outputs)
    lp1, h1, aw1 = bahdanau_attn_decoder_step(tokens[0], last_hidden, encoder_outputs, params)
    jax.block_until_ready((lp1, h1, aw1))
    assert lp1.shape == (1, VOCAB) and h1.shape == (1, 1, HIDDEN) and aw1.shape == (1, 1, SEQ)
    assert jnp.allclose(lp1[0], ref_lp[0], atol=1e-2, rtol=1e-2)

    print("KERNEL_OK")
</pallas_src>

<mosaic_0001>
module attributes {stable_mosaic.version = 11 : i64} {
  func.func @_out_logsoftmax_kernel(%arg0: memref<6x32xf32, #tpu.memory_space<vmem>>, %arg1: memref<32x64xf32, #tpu.memory_space<vmem>>, %arg2: memref<1x64xf32, #tpu.memory_space<vmem>>, %arg3: memref<6x64xf32, #tpu.memory_space<vmem>>) attributes {dimension_semantics = [], scalar_prefetch = 0 : i64, scratch_operands = 0 : i64, tpu.core_type = #tpu.core_type<tc>} {
    %c0 = arith.constant 0 : index
    %c0_0 = arith.constant 0 : index
    %0 = vector.load %arg0[%c0, %c0_0] : memref<6x32xf32, #tpu.memory_space<vmem>>, vector<6x32xf32>
    %c0_1 = arith.constant 0 : index
    %c0_2 = arith.constant 0 : index
    %1 = vector.load %arg1[%c0_1, %c0_2] : memref<32x64xf32, #tpu.memory_space<vmem>>, vector<32x64xf32>
    %cst = arith.constant dense<0.000000e+00> : vector<6x64xf32>
    %2 = tpu.matmul %0, %1, %cst {dimension_numbers = #tpu.dot_dimension_numbers<[1], [0], [0], [1], [0, 0, 1, 1], [], []>, precision = #tpu.contract_precision<fp32>} : vector<6x32xf32>, vector<32x64xf32>, vector<6x64xf32> -> vector<6x64xf32>
    %c0_3 = arith.constant 0 : index
    %c0_4 = arith.constant 0 : index
    %3 = vector.load %arg2[%c0_3, %c0_4] : memref<1x64xf32, #tpu.memory_space<vmem>>, vector<1x64xf32>
    %4 = vector.broadcast %3 : vector<1x64xf32> to vector<6x64xf32>
    %5 = arith.addf %2, %4 : vector<6x64xf32>
    %cst_5 = arith.constant dense<0xFF800000> : vector<6xf32>
    %6 = vector.multi_reduction <maximumf>, %5, %cst_5 [1] : vector<6x64xf32> to vector<6xf32>
    %7 = vector.shape_cast %6 : vector<6xf32> to vector<6x1xf32>
    %8 = vector.broadcast %7 : vector<6x1xf32> to vector<6x64xf32>
    %9 = arith.subf %5, %8 : vector<6x64xf32>
    %10 = math.exp %9 : vector<6x64xf32>
    %cst_6 = arith.constant dense<0.000000e+00> : vector<6xf32>
    %11 = vector.multi_reduction <add>, %10, %cst_6 [1] : vector<6x64xf32> to vector<6xf32>
    %12 = vector.shape_cast %11 : vector<6xf32> to vector<6x1xf32>
    %13 = math.log %12 : vector<6x1xf32>
    %14 = arith.addf %13, %7 : vector<6x1xf32>
    %15 = vector.broadcast %14 : vector<6x1xf32> to vector<6x64xf32>
    %16 = arith.subf %5, %15 : vector<6x64xf32>
    %c0_7 = arith.constant 0 : index
    %c0_8 = arith.constant 0 : index
    %17 = vector.load %arg3[%c0_7, %c0_8] : memref<6x64xf32, #tpu.memory_space<vmem>>, vector<6x64xf32>
    tpu.vector_store %arg3[%c0_7, %c0_8], %16 {strides = array<i32>} : memref<6x64xf32, #tpu.memory_space<vmem>>, vector<6x64xf32>,
    return
  }
}

module attributes {stable_mosaic.version = 11 : i64} {
  func.func @_gru_seq_kernel(%arg0: memref<6x96xf32, #tpu.memory_space<vmem>>, %arg1: memref<1x32xf32, #tpu.memory_space<vmem>>, %arg2: memref<32x96xf32, #tpu.memory_space<vmem>>, %arg3: memref<1x96xf32, #tpu.memory_space<vmem>>, %arg4: memref<6x32xf32, #tpu.memory_space<vmem>>) attributes {dimension_semantics = [], scalar_prefetch = 0 : i64, scratch_operands = 0 : i64, tpu.core_type = #tpu.core_type<tc>} {
    %c0 = arith.constant 0 : index
    %c0_0 = arith.constant 0 : index
    %0 = vector.load %arg1[%c0, %c0_0] : memref<1x32xf32, #tpu.memory_space<vmem>>, vector<1x32xf32>
    %c0_1 = arith.constant 0 : index
    %c0_2 = arith.constant 0 : index
    %1 = vector.load %arg2[%c0_1, %c0_2] : memref<32x96xf32, #tpu.memory_space<vmem>>, vector<32x96xf32>
    %c0_3 = arith.constant 0 : index
    %c0_4 = arith.constant 0 : index
    %2 = vector.load %arg3[%c0_3, %c0_4] : memref<1x96xf32, #tpu.memory_space<vmem>>, vector<1x96xf32>
    %c0_5 = arith.constant 0 : index
    %c0_6 = arith.constant 0 : index
    %3 = vector.load %arg0[%c0_5, %c0_6] : memref<6x96xf32, #tpu.memory_space<vmem>>, vector<1x96xf32>
    %cst = arith.constant dense<0.000000e+00> : vector<1x96xf32>
    %4 = tpu.matmul %0, %1, %cst {dimension_numbers = #tpu.dot_dimension_numbers<[1], [0], [0], [1], [0, 0, 1, 1], [], []>, precision = #tpu.contract_precision<fp32>} : vector<1x32xf32>, vector<32x96xf32>, vector<1x96xf32> -> vector<1x96xf32>
    %5 = arith.addf %4, %2 : vector<1x96xf32>
    %6 = vector.extract_strided_slice %3 {offsets = [0, 0], sizes = [1, 32], strides = [1, 1]} : vector<1x96xf32> to vector<1x32xf32>
    %7 = vector.extract_strided_slice %5 {offsets = [0, 0], sizes = [1, 32], strides = [1, 1]} : vector<1x96xf32> to vector<1x32xf32>
    %8 = arith.addf %6, %7 : vector<1x32xf32>
    %9 = arith.negf %8 : vector<1x32xf32>
    %10 = math.exp %9 : vector<1x32xf32>
    %cst_7 = arith.constant 1.000000e+00 : f32
    %11 = vector.broadcast %cst_7 : f32 to vector<1x32xf32>
    %12 = arith.addf %11, %10 : vector<1x32xf32>
    %13 = arith.divf %11, %12 : vector<1x32xf32>
    %14 = vector.extract_strided_slice %3 {offsets = [0, 32], sizes = [1, 32], strides = [1, 1]} : vector<1x96xf32> to vector<1x32xf32>
    %15 = vector.extract_strided_slice %5 {offsets = [0, 32], sizes = [1, 32], strides = [1, 1]} : vector<1x96xf32> to vector<1x32xf32>
    %16 = arith.addf %14, %15 : vector<1x32xf32>
    %17 = arith.negf %16 : vector<1x32xf32>
    %18 = math.exp %17 : vector<1x32xf32>
    %cst_8 = arith.constant 1.000000e+00 : f32
    %19 = vector.broadcast %cst_8 : f32 to vector<1x32xf32>
    %20 = arith.addf %19, %18 : vector<1x32xf32>
    %21 = arith.divf %19, %20 : vector<1x32xf32>
    %22 = vector.extract_strided_slice %3 {offsets = [0, 64], sizes = [1, 32], strides = [1, 1]} : vector<1x96xf32> to vector<1x32xf32>
    %23 = vector.extract_strided_slice %5 {offsets = [0, 64], sizes = [1, 32], strides = [1, 1]} : vector<1x96xf32> to vector<1x32xf32>
    %24 = arith.mulf %13, %23 : vector<1x32xf32>
    %25 = arith.addf %22, %24 : vector<1x32xf32>
    %26 = math.tanh %25 : vector<1x32xf32>
    %cst_9 = arith.constant 1.000000e+00 : f32
    %27 = vector.broadcast %cst_9 : f32 to vector<1x32xf32>
    %28 = arith.subf %27, %21 : vector<1x32xf32>
    %29 = arith.mulf %28, %26 : vector<1x32xf32>
    %30 = arith.mulf %21, %0 : vector<1x32xf32>
    %31 = arith.addf %29, %30 : vector<1x32xf32>
    %c0_10 = arith.constant 0 : index
    %c0_11 = arith.constant 0 : index
    %32 = vector.load %arg4[%c0_10, %c0_11] : memref<6x32xf32, #tpu.memory_space<vmem>>, vector<1x32xf32>
    tpu.vector_store %arg4[%c0_10, %c0_11], %31 {strides = array<i32>} : memref<6x32xf32, #tpu.memory_space<vmem>>, vector<1x32xf32>,
    %c1 = arith.constant 1 : index
    %c0_12 = arith.constant 0 : index
    %33 = vector.load %arg0[%c1, %c0_12] : memref<6x96xf32, #tpu.memory_space<vmem>>, vector<1x96xf32>
    %cst_13 = arith.constant dense<0.000000e+00> : vector<1x96xf32>
    %34 = tpu.matmul %31, %1, %cst_13 {dimension_numbers = #tpu.dot_dimension_numbers<[1], [0], [0], [1], [0, 0, 1, 1], [], []>, precision = #tpu.contract_precision<fp32>} : vector<1x32xf32>, vector<32x96xf32>, vector<1x96xf32> -> vector<1x96xf32>
    %35 = arith.addf %34, %2 : vector<1x96xf32>
    %36 = vector.extract_strided_slice %33 {offsets = [0, 0], sizes = [1, 32], strides = [1, 1]} : vector<1x96xf32> to vector<1x32xf32>
    %37 = vector.extract_strided_slice %35 {offsets = [0, 0], sizes = [1, 32], strides = [1, 1]} : vector<1x96xf32> to vector<1x32xf32>
    %38 = arith.addf %36, %37 : vector<1x32xf32>
    %39 = arith.negf %38 : vector<1x32xf32>
    %40 = math.exp %39 : vector<1x32xf32>
    %cst_14 = arith.constant 1.000000e+00 : f32
    %41 = vector.broadcast %cst_14 : f32 to vector<1x32xf32>
    %42 = arith.addf %41, %40 : vector<1x32xf32>
    %43 = arith.divf %41, %42 : vector<1x32xf32>
    %44 = vector.extract_strided_slice %33 {offsets = [0, 32], sizes = [1, 32], strides = [1, 1]} : vector<1x96xf32> to vector<1x32xf32>
    %45 = vector.extract_strided_slice %35 {offsets = [0, 32], sizes = [1, 32], strides = [1, 1]} : vector<1x96xf32> to vector<1x32xf32>
    %46 = arith.addf %44, %45 : vector<1x32xf32>
    %47 = arith.negf %46 : vector<1x32xf32>
    %48 = math.exp %47 : vector<1x32xf32>
    %cst_15 = arith.constant 1.000000e+00 : f32
    %49 = vector.broadcast %cst_15 : f32 to vector<1x32xf32>
    %50 = arith.addf %49, %48 : vector<1x32xf32>
    %51 = arith.divf %49, %50 : vector<1x32xf32>
    %52 = vector.extract_strided_slice %33 {offsets = [0, 64], sizes = [1, 32], strides = [1, 1]} : vector<1x96xf32> to vector<1x32xf32>
    %53 = vector.extract_strided_slice %35 {offsets = [0, 64], sizes = [1, 32], strides = [1, 1]} : vector<1x96xf32> to vector<1x32xf32>
    %54 = arith.mulf %43, %53 : vector<1x32xf32>
    %55 = arith.addf %52, %54 : vector<1x32xf32>
    %56 = math.tanh %55 : vector<1x32xf32>
    %cst_16 = arith.constant 1.000000e+00 : f32
    %57 = vector.broadcast %cst_16 : f32 to vector<1x32xf32>
    %58 = arith.subf %57, %51 : vector<1x32xf32>
    %59 = arith.mulf %58, %56 : vector<1x32xf32>
    %60 = arith.mulf %51, %31 : vector<1x32xf32>
    %61 = arith.addf %59, %60 : vector<1x32xf32>
    %c1_17 = arith.constant 1 : index
    %c0_18 = arith.constant 0 : index
    %62 = vector.load %arg4[%c1_17, %c0_18] : memref<6x32xf32, #tpu.memory_space<vmem>>, vector<1x32xf32>
    tpu.vector_store %arg4[%c1_17, %c0_18], %61 {strides = array<i32>} : memref<6x32xf32, #tpu.memory_space<vmem>>, vector<1x32xf32>,
    %c2 = arith.constant 2 : index
    %c0_19 = arith.constant 0 : index
    %63 = vector.load %arg0[%c2, %c0_19] : memref<6x96xf32, #tpu.memory_space<vmem>>, vector<1x96xf32>
    %cst_20 = arith.constant dense<0.000000e+00> : vector<1x96xf32>
    %64 = tpu.matmul %61, %1, %cst_20 {dimension_numbers = #tpu.dot_dimension_numbers<[1], [0], [0], [1], [0, 0, 1, 1], [], []>, precision = #tpu.contract_precision<fp32>} : vector<1x32xf32>, vector<32x96xf32>, vector<1x96xf32> -> vector<1x96xf32>
    %65 = arith.addf %64, %2 : vector<1x96xf32>
    %66 = vector.extract_strided_slice %63 {offsets = [0, 0], sizes = [1, 32], strides = [1, 1]} : vector<1x96xf32> to vector<1x32xf32>
    %67 = vector.extract_strided_slice %65 {offsets = [0, 0], sizes = [1, 32], strides = [1, 1]} : vector<1x96xf32> to vector<1x32xf32>
    %68 = arith.addf %66, %67 : vector<1x32xf32>
    %69 = arith.negf %68 : vector<1x32xf32>
    %70 = math.exp %69 : vector<1x32xf32>
    %cst_21 = arith.constant 1.000000e+00 : f32
    %71 = vector.broadcast %cst_21 : f32 to vector<1x32xf32>
    %72 = arith.addf %71, %70 : vector<1x32xf32>
    %73 = arith.divf %71, %72 : vector<1x32xf32>
    %74 = vector.extract_strided_slice %63 {offsets = [0, 32], sizes = [1, 32], strides = [1, 1]} : vector<1x96xf32> to vector<1x32xf32>
    %75 = vector.extract_strided_slice %65 {offsets = [0, 32], sizes = [1, 32], strides = [1, 1]} : vector<1x96xf32> to vector<1x32xf32>
    %76 = arith.addf %74, %75 : vector<1x32xf32>
    %77 = arith.negf %76 : vector<1x32xf32>
    %78 = math.exp %77 : vector<1x32xf32>
    %cst_22 = arith.constant 1.000000e+00 : f32
    %79 = vector.broadcast %cst_22 : f32 to vector<1x32xf32>
    %80 = arith.addf %79, %78 : vector<1x32xf32>
    %81 = arith.divf %79, %80 : vector<1x32xf32>
    %82 = vector.extract_strided_slice %63 {offsets = [0, 64], sizes = [1, 32], strides = [1, 1]} : vector<1x96xf32> to vector<1x32xf32>
    %83 = vector.extract_strided_slice %65 {offsets = [0, 64], sizes = [1, 32], strides = [1, 1]} : vector<1x96xf32> to vector<1x32xf32>
    %84 = arith.mulf %73, %83 : vector<1x32xf32>
    %85 = arith.addf %82, %84 : vector<1x32xf32>
    %86 = math.tanh %85 : vector<1x32xf32>
    %cst_23 = arith.constant 1.000000e+00 : f32
    %87 = vector.broadcast %cst_23 : f32 to vector<1x32xf32>
    %88 = arith.subf %87, %81 : vector<1x32xf32>
    %89 = arith.mulf %88, %86 : vector<1x32xf32>
    %90 = arith.mulf %81, %61 : vector<1x32xf32>
    %91 = arith.addf %89, %90 : vector<1x32xf32>
    %c2_24 = arith.constant 2 : index
    %c0_25 = arith.constant 0 : index
    %92 = vector.load %arg4[%c2_24, %c0_25] : memref<6x32xf32, #tpu.memory_space<vmem>>, vector<1x32xf32>
    tpu.vector_store %arg4[%c2_24, %c0_25], %91 {strides = array<i32>} : memref<6x32xf32, #tpu.memory_space<vmem>>, vector<1x32xf32>,
    %c3 = arith.constant 3 : index
    %c0_26 = arith.constant 0 : index
    %93 = vector.load %arg0[%c3, %c0_26] : memref<6x96xf32, #tpu.memory_space<vmem>>, vector<1x96xf32>
    %cst_27 = arith.constant dense<0.000000e+00> : vector<1x96xf32>
    %94 = tpu.matmul %91, %1, %cst_27 {dimension_numbers = #tpu.dot_dimension_numbers<[1], [0], [0], [1], [0, 0, 1, 1], [], []>, precision = #tpu.contract_precision<fp32>} : vector<1x32xf32>, vector<32x96xf32>, vector<1x96xf32> -> vector<1x96xf32>
    %95 = arith.addf %94, %2 : vector<1x96xf32>
    %96 = vector.extract_strided_slice %93 {offsets = [0, 0], sizes = [1, 32], strides = [1, 1]} : vector<1x96xf32> to vector<1x32xf32>
    %97 = vector.extract_strided_slice %95 {offsets = [0, 0], sizes = [1, 32], strides = [1, 1]} : vector<1x96xf32> to vector<1x32xf32>
    %98 = arith.addf %96, %97 : vector<1x32xf32>
    %99 = arith.negf %98 : vector<1x32xf32>
    %100 = math.exp %99 : vector<1x32xf32>
    %cst_28 = arith.constant 1.000000e+00 : f32
    %101 = vector.broadcast %cst_28 : f32 to vector<1x32xf32>
    %102 = arith.addf %101, %100 : vector<1x32xf32>
    %103 = arith.divf %101, %102 : vector<1x32xf32>
    %104 = vector.extract_strided_slice %93 {offsets = [0, 32], sizes = [1, 32], strides = [1, 1]} : vector<1x96xf32> to vector<1x32xf32>
    %105 = vector.extract_strided_slice %95 {offsets = [0, 32], sizes = [1, 32], strides = [1, 1]} : vector<1x96xf32> to vector<1x32xf32>
    %106 = arith.addf %104, %105 : vector<1x32xf32>
    %107 = arith.negf %106 : vector<1x32xf32>
    %108 = math.exp %107 : vector<1x32xf32>
    %cst_29 = arith.constant 1.000000e+00 : f32
    %109 = vector.broadcast %cst_29 : f32 to vector<1x32xf32>
    %110 = arith.addf %109, %108 : vector<1x32xf32>
    %111 = arith.divf %109, %110 : vector<1x32xf32>
    %112 = vector.extract_strided_slice %93 {offsets = [0, 64], sizes = [1, 32], strides = [1, 1]} : vector<1x96xf32> to vector<1x32xf32>
    %113 = vector.extract_strided_slice %95 {offsets = [0, 64], sizes = [1, 32], strides = [1, 1]} : vector<1x96xf32> to vector<1x32xf32>
    %114 = arith.mulf %103, %113 : vector<1x32xf32>
    %115 = arith.addf %112, %114 : vector<1x32xf32>
    %116 = math.tanh %115 : vector<1x32xf32>
    %cst_30 = arith.constant 1.000000e+00 : f32
    %117 = vector.broadcast %cst_30 : f32 to vector<1x32xf32>
    %118 = arith.subf %117, %111 : vector<1x32xf32>
    %119 = arith.mulf %118, %116 : vector<1x32xf32>
    %120 = arith.mulf %111, %91 : vector<1x32xf32>
    %121 = arith.addf %119, %120 : vector<1x32xf32>
    %c3_31 = arith.constant 3 : index
    %c0_32 = arith.constant 0 : index
    %122 = vector.load %arg4[%c3_31, %c0_32] : memref<6x32xf32, #tpu.memory_space<vmem>>, vector<1x32xf32>
    tpu.vector_store %arg4[%c3_31, %c0_32], %121 {strides = array<i32>} : memref<6x32xf32, #tpu.memory_space<vmem>>, vector<1x32xf32>,
    %c4 = arith.constant 4 : index
    %c0_33 = arith.constant 0 : index
    %123 = vector.load %arg0[%c4, %c0_33] : memref<6x96xf32, #tpu.memory_space<vmem>>, vector<1x96xf32>
    %cst_34 = arith.constant dense<0.000000e+00> : vector<1x96xf32>
    %124 = tpu.matmul %121, %1, %cst_34 {dimension_numbers = #tpu.dot_dimension_numbers<[1], [0], [0], [1], [0, 0, 1, 1], [], []>, precision = #tpu.contract_precision<fp32>} : vector<1x32xf32>, vector<32x96xf32>, vector<1x96xf32> -> vector<1x96xf32>
    %125 = arith.addf %124, %2 : vector<1x96xf32>
    %126 = vector.extract_strided_slice %123 {offsets = [0, 0], sizes = [1, 32], strides = [1, 1]} : vector<1x96xf32> to vector<1x32xf32>
    %127 = vector.extract_strided_slice %125 {offsets = [0, 0], sizes = [1, 32], strides = [1, 1]} : vector<1x96xf32> to vector<1x32xf32>
    %128 = arith.addf %126, %127 : vector<1x32xf32>
    %129 = arith.negf %128 : vector<1x32xf32>
    %130 = math.exp %129 : vector<1x32xf32>
    %cst_35 = arith.constant 1.000000e+00 : f32
    %131 = vector.broadcast %cst_35 : f32 to vector<1x32xf32>
    %132 = arith.addf %131, %130 : vector<1x32xf32>
    %133 = arith.divf %131, %132 : vector<1x32xf32>
    %134 = vector.extract_strided_slice %123 {offsets = [0, 32], sizes = [1, 32], strides = [1, 1]} : vector<1x96xf32> to vector<1x32xf32>
    %135 = vector.extract_strided_slice %125 {offsets = [0, 32], sizes = [1, 32], strides = [1, 1]} : vector<1x96xf32> to vector<1x32xf32>
    %136 = arith.addf %134, %135 : vector<1x32xf32>
    %137 = arith.negf %136 : vector<1x32xf32>
    %138 = math.exp %137 : vector<1x32xf32>
    %cst_36 = arith.constant 1.000000e+00 : f32
    %139 = vector.broadcast %cst_36 : f32 to vector<1x32xf32>
    %140 = arith.addf %139, %138 : vector<1x32xf32>
    %141 = arith.divf %139, %140 : vector<1x32xf32>
    %142 = vector.extract_strided_slice %123 {offsets = [0, 64], sizes = [1, 32], strides = [1, 1]} : vector<1x96xf32> to vector<1x32xf32>
    %143 = vector.extract_strided_slice %125 {offsets = [0, 64], sizes = [1, 32], strides = [1, 1]} : vector<1x96xf32> to vector<1x32xf32>
    %144 = arith.mulf %133, %143 : vector<1x32xf32>
    %145 = arith.addf %142, %144 : vector<1x32xf32>
    %146 = math.tanh %145 : vector<1x32xf32>
    %cst_37 = arith.constant 1.000000e+00 : f32
    %147 = vector.broadcast %cst_37 : f32 to vector<1x32xf32>
    %148 = arith.subf %147, %141 : vector<1x32xf32>
    %149 = arith.mulf %148, %146 : vector<1x32xf32>
    %150 = arith.mulf %141, %121 : vector<1x32xf32>
    %151 = arith.addf %149, %150 : vector<1x32xf32>
    %c4_38 = arith.constant 4 : index
    %c0_39 = arith.constant 0 : index
    %152 = vector.load %arg4[%c4_38, %c0_39] : memref<6x32xf32, #tpu.memory_space<vmem>>, vector<1x32xf32>
    tpu.vector_store %arg4[%c4_38, %c0_39], %151 {strides = array<i32>} : memref<6x32xf32, #tpu.memory_space<vmem>>, vector<1x32xf32>,
    %c5 = arith.constant 5 : index
    %c0_40 = arith.constant 0 : index
    %153 = vector.load %arg0[%c5, %c0_40] : memref<6x96xf32, #tpu.memory_space<vmem>>, vector<1x96xf32>
    %cst_41 = arith.constant dense<0.000000e+00> : vector<1x96xf32>
    %154 = tpu.matmul %151, %1, %cst_41 {dimension_numbers = #tpu.dot_dimension_numbers<[1], [0], [0], [1], [0, 0, 1, 1], [], []>, precision = #tpu.contract_precision<fp32>} : vector<1x32xf32>, vector<32x96xf32>, vector<1x96xf32> -> vector<1x96xf32>
    %155 = arith.addf %154, %2 : vector<1x96xf32>
    %156 = vector.extract_strided_slice %153 {offsets = [0, 0], sizes = [1, 32], strides = [1, 1]} : vector<1x96xf32> to vector<1x32xf32>
    %157 = vector.extract_strided_slice %155 {offsets = [0, 0], sizes = [1, 32], strides = [1, 1]} : vector<1x96xf32> to vector<1x32xf32>
    %158 = arith.addf %156, %157 : vector<1x32xf32>
    %159 = arith.negf %158 : vector<1x32xf32>
    %160 = math.exp %159 : vector<1x32xf32>
    %cst_42 = arith.constant 1.000000e+00 : f32
    %161 = vector.broadcast %cst_42 : f32 to vector<1x32xf32>
    %162 = arith.addf %161, %160 : vector<1x32xf32>
    %163 = arith.divf %161, %162 : vector<1x32xf32>
    %164 = vector.extract_strided_slice %153 {offsets = [0, 32], sizes = [1, 32], strides = [1, 1]} : vector<1x96xf32> to vector<1x32xf32>
    %165 = vector.extract_strided_slice %155 {offsets = [0, 32], sizes = [1, 32], strides = [1, 1]} : vector<1x96xf32> to vector<1x32xf32>
    %166 = arith.addf %164, %165 : vector<1x32xf32>
    %167 = arith.negf %166 : vector<1x32xf32>
    %168 = math.exp %167 : vector<1x32xf32>
    %cst_43 = arith.constant 1.000000e+00 : f32
    %169 = vector.broadcast %cst_43 : f32 to vector<1x32xf32>
    %170 = arith.addf %169, %168 : vector<1x32xf32>
    %171 = arith.divf %169, %170 : vector<1x32xf32>
    %172 = vector.extract_strided_slice %153 {offsets = [0, 64], sizes = [1, 32], strides = [1, 1]} : vector<1x96xf32> to vector<1x32xf32>
    %173 = vector.extract_strided_slice %155 {offsets = [0, 64], sizes = [1, 32], strides = [1, 1]} : vector<1x96xf32> to vector<1x32xf32>
    %174 = arith.mulf %163, %173 : vector<1x32xf32>
    %175 = arith.addf %172, %174 : vector<1x32xf32>
    %176 = math.tanh %175 : vector<1x32xf32>
    %cst_44 = arith.constant 1.000000e+00 : f32
    %177 = vector.broadcast %cst_44 : f32 to vector<1x32xf32>
    %178 = arith.subf %177, %171 : vector<1x32xf32>
    %179 = arith.mulf %178, %176 : vector<1x32xf32>
    %180 = arith.mulf %171, %151 : vector<1x32xf32>
    %181 = arith.addf %179, %180 : vector<1x32xf32>
    %c5_45 = arith.constant 5 : index
    %c0_46 = arith.constant 0 : index
    %182 = vector.load %arg4[%c5_45, %c0_46] : memref<6x32xf32, #tpu.memory_space<vmem>>, vector<1x32xf32>
    tpu.vector_store %arg4[%c5_45, %c0_46], %181 {strides = array<i32>} : memref<6x32xf32, #tpu.memory_space<vmem>>, vector<1x32xf32>,
    return
  }
}

</mosaic_0001>

<bundles_post_ra>
// kernel: bahdanau_attn_decoder_decode.3
= control target key start
LH: loop header
LB: loop body
LE: loop exit
PB: predicated region body
PF: predicated region fallthrough
CT: control target
= control target key end

     0   :  { %v720_v3 = vmov 0.0|0.0   ;;  %vm721_vm0 = vmmov 0   ;;  %v722_v10 = vmov 0.0   ;;  %vm27_vm1 = vcmask 261120   ;;  %s795_s0 = inlined_call_operand.vmem [shape: f32[6,32], index: 0, kind: input, shape index: {}]   ;;  %s796_s1 = inlined_call_operand.vmem [shape: f32[32,64], index: 1, kind: input, shape index: {}]   ;;  %s797_s2 = inlined_call_operand.vmem [shape: f32[1,64], index: 2, kind: input, shape index: {}]   ;;  %s798_s3 = inlined_call_operand.hbm [shape: f32[6,64], index: 3, kind: output, shape index: {}]  }
   0x1   :  { %v16_v0 = vld [vmem:[%s796_s1] sm:$0xff]  ;;  %v17_v1 = vld [vmem:[%s796_s1 + $0x8] sm:$0xff]  ;;  %v18_v2 = vld [vmem:[%s796_s1 + $0x10] sm:$0xff]  ;;  %642 = vmatprep.subr.bf16.mxu1 %v720_v3  ;;  %660 = vmatprep.subr.bf16.mxu0 %v720_v3 }
   0x2   :  { %v32_v4 = vand.u32 4294901760, %v16_v0  ;;  %v35_v5 = vand.u32 4294901760, %v17_v1  ;;  %v19_v6 = vld [vmem:[%s796_s1 + $0x18] sm:$0xff]  ;;  %v38_v7 = vand.u32 4294901760, %v18_v2  ;;  %v15_v8 = vld [vmem:[%s795_s0] sm:$0x3f]  ;;  %584 = vmatprep.mubr.msk.f32.mxu1 %vm721_vm0, %v722_v10  ;;  %617 = vmatprep.mubr.msk.f32.mxu0 %vm721_vm0, %v722_v10 }
   0x3   :  { %v41_v9 = vand.u32 4294901760, %v19_v6 }
   0x4   :  { %8 = vsyncpa [#allocation3], 0  ;;  %v643_v11 = vpack.c.bf16 %v35_v5, %v32_v4  ;;  %v112_v12 = vsub.f32 %v16_v0, %v32_v4  ;;  %v119_v13 = vsub.f32 %v17_v1, %v35_v5  ;;  %v126_v14 = vsub.f32 %v18_v2, %v38_v7  ;;  %v545_v42 = vld [vmem:[%s797_s2] ss:$0 sm:$0xff]  ;;  %s723_s2 = smov [#allocation2]  }
   0x5   :  { %v646_v15 = vpack.c.bf16 %v41_v9, %v38_v7  ;;  %v133_v16 = vsub.f32 %v19_v6, %v41_v9  ;;  %v29_v17 = vsel %vm27_vm1, %v15_v8, 0  ;;  %vm516_vm2 = vcmask 521216   ;;  %s537_s22 = sshll.u32 %s723_s2, 4  ;;  %s538_s22 = int_to_ptr.vmem [resolvable:$true] %s537_s22 }
   0x6   :  { %644 = vmatpush3.bf16.msra.mxu1 %v643_v11  ;;  %662 = vmatpush3.bf16.msra.mxu0 %v643_v11  ;;  %v100_v18 = vand.u32 4294901760, %v29_v17  ;;  %v113_v19 = vand.u32 4294901760, %v112_v12  ;;  %v120_v20 = vand.u32 4294901760, %v119_v13  ;;  %v127_v21 = vand.u32 4294901760, %v126_v14  ;;  %s696_s23 = scalar_lea.vmem %s538_s22, 128  ;;  %p701_p1 = scmp.lt.s32.totalorder %s538_s22, %s538_s22 }
   0x7   :  { %645 = vmatprep.subr.bf16.mxu1 %v720_v3  ;;  %663 = vmatprep.subr.bf16.mxu0 %v720_v3  ;;  %v134_v22 = vand.u32 4294901760, %v133_v16  ;;  %v655_v39 = vpack.c.bf16 %v119_v13, %v112_v12  ;;  %v658_v40 = vpack.c.bf16 %v133_v16, %v126_v14  ;;  %p697_p0 = scmp.ne.s32.totalorder %s538_s22, %s696_s23  ;;  %p702_p2 = scmp.lt.s32.totalorder %s696_s23, %s696_s23 }
   0x8   :  { %v101_v23 = vsub.f32 %v29_v17, %v100_v18  ;;  %v114_v24 = vsub.f32 %v112_v12, %v113_v19  ;;  %v121_v25 = vsub.f32 %v119_v13, %v120_v20  ;;  %v128_v26 = vsub.f32 %v126_v14, %v127_v21 }
   0x9   :  { %v135_v27 = vsub.f32 %v133_v16, %v134_v22  ;;  %v667_v31 = vpack.c.bf16 %v120_v20, %v113_v19  ;;  %v670_v37 = vpack.c.bf16 %v134_v22, %v127_v21  ;;  %p703_p3 = por %p702_p2, %p701_p1 }
   0xa   :  { %647 = vmatpush3.bf16.msra.mxu1 %v646_v15  ;;  %665 = vmatpush3.bf16.msra.mxu0 %v646_v15  ;;  %v102_v28 = vand.u32 4294901760, %v101_v23  ;;  %v115_v29 = vand.u32 4294901760, %v114_v24  ;;  %v122_v30 = vand.u32 4294901760, %v121_v25  ;;  %v129_v34 = vand.u32 4294901760, %v128_v26 }
   0xb   :  { %648 = vmatprep.subr.bf16.mxu1 %v720_v3  ;;  %666 = vmatprep.subr.bf16.mxu0 %v720_v3  ;;  %v136_v35 = vand.u32 4294901760, %v135_v27  ;;  %p704_p4 = pnand %p703_p3, %p697_p0 }
   0xc   :  { %v103_v32 = vsub.f32 %v101_v23, %v102_v28  ;;  %v649_v33 = vpack.c.bf16 %v122_v30, %v115_v29 }
   0xd   :  { %618 = vmatmul.mubr.f32.vlgmr.msra.gmra.mrb[0].mxu0 %v102_v28  ;;  %v652_v38 = vpack.c.bf16 %v136_v35, %v129_v34 }
   0xe   :  { %v104_v36 = vand.u32 4294901760, %v103_v32  ;;  %668 = vmatpush3.bf16.msra.mxu0 %v667_v31  ;;  %628 = vmatprep.mubr.msk.f32.mxu0 %vm721_vm0, %v722_v10 }
   0xf   :  { %669 = vmatprep.subr.bf16.mxu0 %v720_v3 }
  0x10   :  { %585 = vmatmul.mubr.f32.vlgmr.msra.gmra.mrb[0].mxu1 %v104_v36 }
  0x11   :  { %650 = vmatpush3.bf16.msra.mxu1 %v649_v33  ;;  %595 = vmatprep.mubr.msk.f32.mxu1 %vm721_vm0, %v722_v10 }
  0x12   :  { %651 = vmatprep.subr.bf16.mxu1 %v720_v3  ;;  %671 = vmatpush3.bf16.msra.mxu0 %v670_v37 }
  0x13   :  { %672 = vmatprep.subr.bf16.mxu0 %v720_v3 }
  0x15   :  { %653 = vmatpush3.bf16.msra.mxu1 %v652_v38  ;;  %629 = vmatmul.mubr.f32.vlgmr.msra.gmra.mrb[0].mxu0 %v100_v18 }
  0x16   :  { %654 = vmatprep.subr.bf16.mxu1 %v720_v3  ;;  %674 = vmatpush3.bf16.msra.mxu0 %v643_v11 }
  0x17   :  { %675 = vmatprep.subr.bf16.mxu0 %v720_v3  ;;  %639 = vmatprep.mubr.msk.f32.mxu0 %vm721_vm0, %v722_v10 }
  0x18   :  { %596 = vmatmul.mubr.f32.vlgmr.msra.gmra.mrb[0].mxu1 %v100_v18 }
  0x19   :  { %656 = vmatpush3.bf16.msra.mxu1 %v655_v39  ;;  %606 = vmatprep.mubr.msk.f32.mxu1 %vm721_vm0, %v722_v10 }
  0x1a   :  { %657 = vmatprep.subr.bf16.mxu1 %v720_v3  ;;  %677 = vmatpush3.bf16.msra.mxu0 %v646_v15 }
  0x1d   :  { %659 = vmatpush3.bf16.msra.mxu1 %v658_v40  ;;  %640 = vmatmul.mubr.f32.vlgmr.msra.gmra.mrb[0].mxu0 %v100_v18 }
  0x20   :  { %607 = vmatmul.mubr.f32.vlgmr.msra.gmra.mrb[0].mxu1 %v101_v23 }
  0xf0   :  { %v512_v41 = vpop.f32.mrb[0].mxu0 }
  0xf1   :  { %v641_v43 = vpop.f32.mrb[1].mxu0 }
  0xf3   :  { %v277_v44 = vpop.f32.mrb[0].mxu1 }
  0xf4   :  { %v678_v45 = vadd.f32 %v545_v42, %v277_v44  ;;  %v608_v46 = vpop.f32.mrb[1].mxu1 }
  0xf6   :  { %v679_v47 = vadd.f32 %v678_v45, %v512_v41 }
  0xf8   :  { %v517_v48 = vsel %vm516_vm2, %v679_v47, -inf }
  0xf9   :  { %518 = vmax.xlane.f32.xlu0 %v517_v48 }
 0x186   :  { %v519_v49 = vpop.xlane.xlu0 %518 }
 0x187   :  { %v520_v50 = vsub.f32 %v679_v47, %v519_v49 }
 0x189   :  { %v521_v51 = vmul.f32 1.442695, %v520_v50 }
 0x18b   :  { %692 = vpow2.f32 %v521_v51 }
 0x195   :  { %v693_v52 = vpop.eup %692 }
 0x196   :  { %v523_v53 = vsel %vm516_vm2, %v693_v52, 0.0 }
 0x197   :  { %524 = vadd.xlane.f32.xlu0 %v523_v53 }
 0x224   :  { %v525_v54 = vpop.xlane.xlu0 %524 }
 0x225   :  { %694 = vlog2.f32 %v525_v54 }
 0x22f   :  { %v695_v55 = vpop.eup %694 }
 0x230   :  { %v527_v56 = vmul.f32 0.6931472, %v695_v55 }
 0x232   :  { %v528_v57 = vadd.f32 %v527_v56, %v519_v49 }
 0x234   :  { %v529_v58 = vsub.f32 %v679_v47, %v528_v57 }
 0x236   :  { %530 = vst.msk [vmem:[#allocation2] sm:$0x3f] %vm516_vm2, %v529_v58 }
 0x237   :  { %707 = shalt.err (!%p704_p4)
}
 0x238   :  { %s708_s26 = scalar_lea.hbm %s798_s3, 128 }
 0x239   :  { %p709_p5 = scmp.ne.s32.totalorder %s798_s3, %s708_s26  ;;  %p712_p6 = scmp.lt.u32.totalorder %s708_s26, %s798_s3 }
 0x23b   :  { %p714_p7 = pnand %p712_p6, %p709_p5 }
 0x23d   :  { %717 = shalt.err (!%p714_p7)
}
 0x23e   :  { %540 = dma.vmem_to_hbm [thread:$0]  %s538_s22, 128, %s798_s3, [#allocation3]  }
 0x23f   :  { %718 = dma.done.wait [#allocation3], 128  }
 0x240   :  { %719 = vsyncadd [#allocation3], 4294967168 }
 0x241   :  { %544 = vsyncpa [#allocation3], 1 }

// kernel: bahdanau_attn_decoder_decode.2
= control target key start
LH: loop header
LB: loop body
LE: loop exit
PB: predicated region body
PF: predicated region fallthrough
CT: control target
= control target key end

     0   :  { %vm24_vm0 = vcmask 261120   ;;  %v4057_v0 = vmov 0.0|0.0   ;;  %vm4058_vm1 = vmmov 0   ;;  %v4059_v4 = vmov 0.0   ;;  %s4060_s25 = smov 64   ;;  %s4062_s28 = smov 32   ;;  %s4440_s2 = inlined_call_operand.vmem [shape: f32[32,96], index: 2, kind: input, shape index: {}]   ;;  %s4441_s1 = inlined_call_operand.vmem [shape: f32[1,32], index: 1, kind: input, shape index: {}]   ;;  %s4442_s3 = inlined_call_operand.vmem [shape: f32[1,96], index: 3, kind: input, shape index: {}]   ;;  %s4443_s0 = inlined_call_operand.vmem [shape: f32[6,96], index: 0, kind: input, shape index: {}]   ;;  %s4444_s4 = inlined_call_operand.vmem [shape: f32[6,32], index: 4, kind: output, shape index: {}]  }
   0x1   :  { %3733 = vmatprep.subr.bf16.mxu0 %v4057_v0  ;;  %v18_v1 = vld [vmem:[%s4440_s2] sm:$0xff]  ;;  %v19_v2 = vld [vmem:[%s4440_s2 + $0x8] sm:$0xff]  ;;  %v20_v3 = vld [vmem:[%s4440_s2 + $0x10] sm:$0xff]  ;;  %3345 = vmatprep.mubr.msk.f32.mxu0 %vm4058_vm1, %v4059_v4  ;;  %v537_v55 = vlaneseq  ;;  %vm550_vm2 = vcmask 253952  }
   0x2   :  { %v29_v5 = vand.u32 4294901760, %v18_v1  ;;  %v32_v6 = vand.u32 4294901760, %v19_v2  ;;  %v21_v7 = vld [vmem:[%s4440_s2 + $0x18] sm:$0xff]  ;;  %v35_v8 = vand.u32 4294901760, %v20_v3  ;;  %v4106_v9 = vld [vmem:[%s4441_s1] sm:$0x1]  ;;  %3769 = vmatprep.subr.bf16.mxu1 %v4057_v0  ;;  %3411 = vmatprep.mubr.msk.f32.mxu1 %vm4058_vm1, %v4059_v4 }
   0x3   :  { %v38_v10 = vand.u32 4294901760, %v21_v7  ;;  %v26_v11 = vsel %vm24_vm0, %v4106_v9, 0  ;;  %v4182_v41 = vld [vmem:[%s4442_s3] sm:$0x1]  ;;  %v538_v56 = vshrl.u32 %v537_v55, 7  ;;  %s4061_s3 = smov 96  }
   0x4   :  { %v4113_v12 = vpack.c.bf16 %v32_v6, %v29_v5  ;;  %v4115_v13 = vand.u32 4294901760, %v26_v11  ;;  %v109_v14 = vsub.f32 %v18_v1, %v29_v5  ;;  %v116_v15 = vsub.f32 %v19_v2, %v32_v6  ;;  %v23_v45 = vld [vmem:[%s4443_s0] sm:$0x1] }
   0x5   :  { %v123_v16 = vsub.f32 %v20_v3, %v35_v8  ;;  %v130_v17 = vsub.f32 %v21_v7, %v38_v10  ;;  %v4118_v18 = vpack.c.bf16 %v38_v10, %v35_v8  ;;  %v539_v57 = vsub.s32 0, %v538_v56 }
   0x6   :  { %3735 = vmatpush3.bf16.msra.mxu0 %v4113_v12  ;;  %v98_v19 = vsub.f32 %v26_v11, %v4115_v13  ;;  %v110_v20 = vand.u32 4294901760, %v109_v14  ;;  %v117_v21 = vand.u32 4294901760, %v116_v15  ;;  %3771 = vmatpush3.bf16.msra.mxu1 %v4113_v12  ;;  %v4137_v37 = vpack.c.bf16 %v116_v15, %v109_v14 }
   0x7   :  { %3736 = vmatprep.subr.bf16.mxu0 %v4057_v0  ;;  %v124_v22 = vand.u32 4294901760, %v123_v16  ;;  %v131_v23 = vand.u32 4294901760, %v130_v17  ;;  %3772 = vmatprep.subr.bf16.mxu1 %v4057_v0  ;;  %v4142_v38 = vpack.c.bf16 %v130_v17, %v123_v16  ;;  %v540_v59 = vrot.slane %v4106_v9, %v539_v57 }
   0x8   :  { %v99_v24 = vand.u32 4294901760, %v98_v19  ;;  %v111_v25 = vsub.f32 %v109_v14, %v110_v20  ;;  %v118_v26 = vsub.f32 %v116_v15, %v117_v21  ;;  %v4154_v39 = vpack.c.bf16 %v117_v21, %v110_v20  ;;  %v552_v15 = vld [vmem:[%s4443_s0 + $0x1] sm:$0x1] }
   0x9   :  { %v125_v27 = vsub.f32 %v123_v16, %v124_v22  ;;  %v132_v28 = vsub.f32 %v130_v17, %v131_v23  ;;  %v4158_v40 = vpack.c.bf16 %v131_v23, %v124_v22 }
   0xa   :  { %3738 = vmatpush3.bf16.msra.mxu0 %v4118_v18  ;;  %v100_v29 = vsub.f32 %v98_v19, %v99_v24  ;;  %v112_v30 = vand.u32 4294901760, %v111_v25  ;;  %v119_v31 = vand.u32 4294901760, %v118_v26  ;;  %3774 = vmatpush3.bf16.msra.mxu1 %v4118_v18 }
   0xb   :  { %3739 = vmatprep.subr.bf16.mxu0 %v4057_v0  ;;  %v126_v32 = vand.u32 4294901760, %v125_v27  ;;  %v133_v33 = vand.u32 4294901760, %v132_v28  ;;  %3775 = vmatprep.subr.bf16.mxu1 %v4057_v0 }
   0xc   :  { %v101_v34 = vand.u32 4294901760, %v100_v29  ;;  %v4128_v35 = vpack.c.bf16 %v119_v31, %v112_v30 }
   0xd   :  { %v4131_v36 = vpack.c.bf16 %v133_v33, %v126_v32 }
   0xe   :  { %3346 = vmatmul.mubr.f32.vlgmr.msra.gmra.mrb[0].mxu0 %v101_v34 }
   0xf   :  { %3741 = vmatpush3.bf16.msra.mxu0 %v4128_v35  ;;  %3356 = vmatprep.mubr.msk.f32.mxu0 %vm4058_vm1, %v4059_v4 }
  0x10   :  { %3742 = vmatprep.subr.bf16.mxu0 %v4057_v0 }
  0x13   :  { %3744 = vmatpush3.bf16.msra.mxu0 %v4131_v36 }
  0x14   :  { %3745 = vmatprep.subr.bf16.mxu0 %v4057_v0 }
  0x16   :  { %3357 = vmatmul.mubr.f32.vlgmr.msra.gmra.mrb[0].mxu0 %v4115_v13 }
  0x17   :  { %3747 = vmatpush3.bf16.msra.mxu0 %v4137_v37  ;;  %3367 = vmatprep.mubr.msk.f32.mxu0 %vm4058_vm1, %v4059_v4 }
  0x18   :  { %3748 = vmatprep.subr.bf16.mxu0 %v4057_v0 }
  0x1b   :  { %3750 = vmatpush3.bf16.msra.mxu0 %v4142_v38 }
  0x1c   :  { %3751 = vmatprep.subr.bf16.mxu0 %v4057_v0 }
  0x1e   :  { %3368 = vmatmul.mubr.f32.vlgmr.msra.gmra.mrb[0].mxu0 %v98_v19 }
  0x1f   :  { %3753 = vmatpush3.bf16.msra.mxu0 %v4113_v12  ;;  %3378 = vmatprep.mubr.msk.f32.mxu0 %vm4058_vm1, %v4059_v4 }
  0x20   :  { %3754 = vmatprep.subr.bf16.mxu0 %v4057_v0 }
  0x23   :  { %3756 = vmatpush3.bf16.msra.mxu0 %v4118_v18 }
  0x24   :  { %3757 = vmatprep.subr.bf16.mxu0 %v4057_v0 }
  0x26   :  { %3379 = vmatmul.mubr.f32.vlgmr.msra.gmra.mrb[0].mxu0 %v99_v24 }
  0x27   :  { %3759 = vmatpush3.bf16.msra.mxu0 %v4154_v39  ;;  %3389 = vmatprep.mubr.msk.f32.mxu0 %vm4058_vm1, %v4059_v4 }
  0x28   :  { %3760 = vmatprep.subr.bf16.mxu0 %v4057_v0 }
  0x2b   :  { %3762 = vmatpush3.bf16.msra.mxu0 %v4158_v40 }
  0x2c   :  { %3763 = vmatprep.subr.bf16.mxu0 %v4057_v0 }
  0x2e   :  { %3390 = vmatmul.mubr.f32.vlgmr.msra.gmra.mrb[0].mxu0 %v4115_v13 }
  0x2f   :  { %3765 = vmatpush3.bf16.msra.mxu0 %v4113_v12  ;;  %3400 = vmatprep.mubr.msk.f32.mxu0 %vm4058_vm1, %v4059_v4 }
  0x30   :  { %3766 = vmatprep.subr.bf16.mxu0 %v4057_v0 }
  0x33   :  { %3768 = vmatpush3.bf16.msra.mxu0 %v4118_v18 }
  0x34   :  { %3805 = vmatprep.subr.bf16.mxu0 %v4057_v0 }
  0x36   :  { %3401 = vmatmul.mubr.f32.vlgmr.msra.gmra.mrb[0].mxu0 %v4115_v13 }
  0x37   :  { %3807 = vmatpush3.bf16.msra.mxu0 %v4113_v12  ;;  %3477 = vmatprep.mubr.msk.f32.mxu0 %vm4058_vm1, %v4059_v4 }
  0x38   :  { %3808 = vmatprep.subr.bf16.mxu0 %v4057_v0 }
  0x3b   :  { %3810 = vmatpush3.bf16.msra.mxu0 %v4118_v18 }
  0x3c   :  { %3811 = vmatprep.subr.bf16.mxu0 %v4057_v0 }
 0x109   :  { %v509_v42 = vpop.f32.mrb[0].mxu0 }
 0x10a   :  { %v3949_v43 = vadd.f32 %v509_v42, %v4182_v41  ;;  %v3402_v44 = vpop.f32.mrb[1].mxu0 }
 0x10c   :  { %521 = vrot.lane.b32.xlu0 %v3949_v43, %s4060_s25  ;;  %v513_v46 = vadd.f32 %v3949_v43, %v23_v45 }
 0x10e   :  { %v3151_v47 = vmul.f32 -1.442695, %v513_v46 }
 0x110   :  { %4021 = vpow2.f32 %v3151_v47 }
 0x11a   :  { %v4022_v48 = vpop.eup %4021 }
 0x11b   :  { %v517_v49 = vadd.f32 1.0, %v4022_v48 }
 0x11d   :  { %4023 = vrcp.f32 %v517_v49  ;;  %v1071_v49 = vld [vmem:[%s4443_s0 + $0x2] sm:$0x1] }
 0x127   :  { %v4024_v50 = vpop.eup %4023 }
 0x128   :  { %v531_v61 = vsub.f32 1.0, %v4024_v50 }
 0x17e   :  { %v522_v51 = vpop.permute.xlu0 %521 }
 0x17f   :  { %v524_v52 = vmul.f32 %v4024_v50, %v522_v51 }
 0x181   :  { %526 = vrot.lane.b32.xlu0 %v524_v52, %s4060_s25 }
 0x1f3   :  { %v527_v53 = vpop.permute.xlu0 %526 }
 0x1f4   :  { %v529_v54 = vadd.f32 %v527_v53, %v23_v45 }
 0x1f6   :  { %4025 = vtanh.f32 %v529_v54 }
 0x200   :  { %v4026_v58 = vpop.eup %4025 }
 0x201   :  { %533 = vrot.lane.b32.xlu1 %v4026_v58, %s4061_s3 }
 0x205   :  { %541 = vrot.lane.b32.xlu1 %v540_v59, %s4062_s28 }
 0x273   :  { %v534_v60 = vpop.permute.xlu1 %533 }
 0x274   :  { %v536_v63 = vmul.f32 %v534_v60, %v531_v61 }
 0x277   :  { %v542_v62 = vpop.permute.xlu1 %541 }
 0x278   :  { %v544_v1 = vmul.f32 %v4024_v50, %v542_v62 }
 0x27a   :  { %v4192_v2 = vadd.f32 %v544_v1, %v536_v63 }
 0x27c   :  { %547 = vrot.lane.b32.xlu0 %v4192_v2, %s4061_s3 }
 0x2ee   :  { %v548_v3 = vpop.permute.xlu0 %547 }
 0x2ef   :  { %551 = vst.msk [vmem:[%s4444_s4] sm:$0x1] %vm550_vm2, %v548_v3  ;;  %v553_v5 = vsel %vm24_vm0, %v548_v3, 0 }
 0x2f0   :  { %v624_v6 = vand.u32 4294901760, %v553_v5 }
 0x2f2   :  { %v625_v7 = vsub.f32 %v553_v5, %v624_v6 }
 0x2f4   :  { %v626_v8 = vand.u32 4294901760, %v625_v7 }
 0x2f6   :  { %v627_v9 = vsub.f32 %v625_v7, %v626_v8 }
 0x2f8   :  { %v628_v10 = vand.u32 4294901760, %v627_v9 }
 0x2fa   :  { %3412 = vmatmul.mubr.f32.vlgmr.msra.gmra.mrb[0].mxu1 %v628_v10 }
 0x2fb   :  { %3777 = vmatpush3.bf16.msra.mxu1 %v4128_v35  ;;  %3422 = vmatprep.mubr.msk.f32.mxu1 %vm4058_vm1, %v4059_v4 }
 0x2fc   :  { %3778 = vmatprep.subr.bf16.mxu1 %v4057_v0 }
 0x2ff   :  { %3780 = vmatpush3.bf16.msra.mxu1 %v4131_v36 }
 0x300   :  { %3781 = vmatprep.subr.bf16.mxu1 %v4057_v0 }
 0x302   :  { %3423 = vmatmul.mubr.f32.vlgmr.msra.gmra.mrb[0].mxu1 %v624_v6 }
 0x303   :  { %3783 = vmatpush3.bf16.msra.mxu1 %v4137_v37  ;;  %3433 = vmatprep.mubr.msk.f32.mxu1 %vm4058_vm1, %v4059_v4 }
 0x304   :  { %3784 = vmatprep.subr.bf16.mxu1 %v4057_v0 }
 0x307   :  { %3786 = vmatpush3.bf16.msra.mxu1 %v4142_v38 }
 0x308   :  { %3787 = vmatprep.subr.bf16.mxu1 %v4057_v0 }
 0x30a   :  { %3434 = vmatmul.mubr.f32.vlgmr.msra.gmra.mrb[0].mxu1 %v625_v7 }
 0x30b   :  { %3789 = vmatpush3.bf16.msra.mxu1 %v4113_v12  ;;  %3444 = vmatprep.mubr.msk.f32.mxu1 %vm4058_vm1, %v4059_v4 }
 0x30c   :  { %3790 = vmatprep.subr.bf16.mxu1 %v4057_v0 }
 0x30f   :  { %3792 = vmatpush3.bf16.msra.mxu1 %v4118_v18 }
 0x310   :  { %3793 = vmatprep.subr.bf16.mxu1 %v4057_v0 }
 0x312   :  { %3445 = vmatmul.mubr.f32.vlgmr.msra.gmra.mrb[0].mxu1 %v626_v8 }
 0x313   :  { %3795 = vmatpush3.bf16.msra.mxu1 %v4154_v39  ;;  %3455 = vmatprep.mubr.msk.f32.mxu1 %vm4058_vm1, %v4059_v4 }
 0x314   :  { %3796 = vmatprep.subr.bf16.mxu1 %v4057_v0 }
 0x317   :  { %3798 = vmatpush3.bf16.msra.mxu1 %v4158_v40 }
 0x318   :  { %3799 = vmatprep.subr.bf16.mxu1 %v4057_v0 }
 0x31a   :  { %3456 = vmatmul.mubr.f32.vlgmr.msra.gmra.mrb[0].mxu1 %v624_v6 }
 0x31b   :  { %3801 = vmatpush3.bf16.msra.mxu1 %v4113_v12  ;;  %3466 = vmatprep.mubr.msk.f32.mxu1 %vm4058_vm1, %v4059_v4 }
 0x31c   :  { %3802 = vmatprep.subr.bf16.mxu1 %v4057_v0 }
 0x31f   :  { %3804 = vmatpush3.bf16.msra.mxu1 %v4118_v18 }
 0x320   :  { %3841 = vmatprep.subr.bf16.mxu1 %v4057_v0 }
 0x322   :  { %3467 = vmatmul.mubr.f32.vlgmr.msra.gmra.mrb[0].mxu1 %v624_v6 }
 0x323   :  { %3843 = vmatpush3.bf16.msra.mxu1 %v4113_v12  ;;  %3543 = vmatprep.mubr.msk.f32.mxu1 %vm4058_vm1, %v4059_v4 }
 0x324   :  { %3844 = vmatprep.subr.bf16.mxu1 %v4057_v0 }
 0x327   :  { %3846 = vmatpush3.bf16.msra.mxu1 %v4118_v18 }
 0x328   :  { %3847 = vmatprep.subr.bf16.mxu1 %v4057_v0 }
 0x3f5   :  { %v1036_v11 = vpop.f32.mrb[0].mxu1 }
 0x3f6   :  { %v3950_v13 = vadd.f32 %v1036_v11, %v4182_v41  ;;  %v3468_v14 = vpop.f32.mrb[1].mxu1 }
 0x3f7   :  { %v1590_v14 = vld [vmem:[%s4443_s0 + $0x3] sm:$0x1] }
 0x3f8   :  { %1048 = vrot.lane.b32.xlu1 %v3950_v13, %s4060_s25  ;;  %v1040_v16 = vadd.f32 %v3950_v13, %v552_v15 }
 0x3fa   :  { %v3152_v17 = vmul.f32 -1.442695, %v1040_v16 }
 0x3fc   :  { %4027 = vpow2.f32 %v3152_v17 }
 0x406   :  { %v4028_v19 = vpop.eup %4027 }
 0x407   :  { %v1044_v20 = vadd.f32 1.0, %v4028_v19 }
 0x409   :  { %4029 = vrcp.f32 %v1044_v20 }
 0x413   :  { %v4030_v21 = vpop.eup %4029 }
 0x414   :  { %v1058_v27 = vsub.f32 1.0, %v4030_v21  ;;  %v1064_v29 = vmul.f32 %v4030_v21, %v4192_v2 }
 0x46a   :  { %v1049_v22 = vpop.permute.xlu1 %1048 }
 0x46b   :  { %v1051_v23 = vmul.f32 %v4030_v21, %v1049_v22 }
 0x46d   :  { %1053 = vrot.lane.b32.xlu0 %v1051_v23, %s4060_s25 }
 0x4df   :  { %v1054_v24 = vpop.permute.xlu0 %1053 }
 0x4e0   :  { %v1056_v25 = vadd.f32 %v1054_v24, %v552_v15 }
 0x4e2   :  { %4031 = vtanh.f32 %v1056_v25 }
 0x4ec   :  { %v4032_v26 = vpop.eup %4031 }
 0x4ed   :  { %1060 = vrot.lane.b32.xlu1 %v4032_v26, %s4061_s3 }
 0x55f   :  { %v1061_v28 = vpop.permute.xlu1 %1060 }
 0x560   :  { %v1063_v30 = vmul.f32 %v1061_v28, %v1058_v27 }
 0x562   :  { %v4245_v31 = vadd.f32 %v1064_v29, %v1063_v30 }
 0x564   :  { %1067 = vrot.lane.b32.xlu0 %v4245_v31, %s4061_s3 }
 0x5d6   :  { %v1068_v32 = vpop.permute.xlu0 %1067 }
 0x5d7   :  { %1070 = vst.msk [vmem:[%s4444_s4 + $0x1] sm:$0x1] %vm550_vm2, %v1068_v32  ;;  %v1072_v33 = vsel %vm24_vm0, %v1068_v32, 0 }
 0x5d8   :  { %v1143_v34 = vand.u32 4294901760, %v1072_v33 }
 0x5da   :  { %v1144_v42 = vsub.f32 %v1072_v33, %v1143_v34 }
 0x5dc   :  { %v1145_v43 = vand.u32 4294901760, %v1144_v42 }
 0x5de   :  { %v1146_v44 = vsub.f32 %v1144_v42, %v1145_v43 }
 0x5e0   :  { %v1147_v45 = vand.u32 4294901760, %v1146_v44 }
 0x5e2   :  { %3478 = vmatmul.mubr.f32.vlgmr.msra.gmra.mrb[2].mxu0 %v1147_v45 }
 0x5e3   :  { %3813 = vmatpush3.bf16.msra.mxu0 %v4128_v35  ;;  %3488 = vmatprep.mubr.msk.f32.mxu0 %vm4058_vm1, %v4059_v4 }
 0x5e4   :  { %3814 = vmatprep.subr.bf16.mxu0 %v4057_v0 }
 0x5e7   :  { %3816 = vmatpush3.bf16.msra.mxu0 %v4131_v36 }
 0x5e8   :  { %3817 = vmatprep.subr.bf16.mxu0 %v4057_v0 }
 0x5ea   :  { %3489 = vmatmul.mubr.f32.vlgmr.msra.gmra.mrb[2].mxu0 %v1143_v34 }
 0x5eb   :  { %3819 = vmatpush3.bf16.msra.mxu0 %v4137_v37  ;;  %3499 = vmatprep.mubr.msk.f32.mxu0 %vm4058_vm1, %v4059_v4 }
 0x5ec   :  { %3820 = vmatprep.subr.bf16.mxu0 %v4057_v0 }
 0x5ef   :  { %3822 = vmatpush3.bf16.msra.mxu0 %v4142_v38 }
 0x5f0   :  { %3823 = vmatprep.subr.bf16.mxu0 %v4057_v0 }
 0x5f2   :  { %3500 = vmatmul.mubr.f32.vlgmr.msra.gmra.mrb[2].mxu0 %v1144_v42 }
 0x5f3   :  { %3825 = vmatpush3.bf16.msra.mxu0 %v4113_v12  ;;  %3510 = vmatprep.mubr.msk.f32.mxu0 %vm4058_vm1, %v4059_v4 }
 0x5f4   :  { %3826 = vmatprep.subr.bf16.mxu0 %v4057_v0 }
 0x5f7   :  { %3828 = vmatpush3.bf16.msra.mxu0 %v4118_v18 }
 0x5f8   :  { %3829 = vmatprep.subr.bf16.mxu0 %v4057_v0 }
 0x5fa   :  { %3511 = vmatmul.mubr.f32.vlgmr.msra.gmra.mrb[2].mxu0 %v1145_v43 }
 0x5fb   :  { %3831 = vmatpush3.bf16.msra.mxu0 %v4154_v39  ;;  %3521 = vmatprep.mubr.msk.f32.mxu0 %vm4058_vm1, %v4059_v4 }
 0x5fc   :  { %3832 = vmatprep.subr.bf16.mxu0 %v4057_v0 }
 0x5ff   :  { %3834 = vmatpush3.bf16.msra.mxu0 %v4158_v40 }
 0x600   :  { %3835 = vmatprep.subr.bf16.mxu0 %v4057_v0 }
 0x602   :  { %3522 = vmatmul.mubr.f32.vlgmr.msra.gmra.mrb[2].mxu0 %v1143_v34 }
 0x603   :  { %3837 = vmatpush3.bf16.msra.mxu0 %v4113_v12  ;;  %3532 = vmatprep.mubr.msk.f32.mxu0 %vm4058_vm1, %v4059_v4 }
 0x604   :  { %3838 = vmatprep.subr.bf16.mxu0 %v4057_v0 }
 0x607   :  { %3840 = vmatpush3.bf16.msra.mxu0 %v4118_v18 }
 0x608   :  { %3877 = vmatprep.subr.bf16.mxu0 %v4057_v0 }
 0x60a   :  { %3533 = vmatmul.mubr.f32.vlgmr.msra.gmra.mrb[2].mxu0 %v1143_v34 }
 0x60b   :  { %3879 = vmatpush3.bf16.msra.mxu0 %v4113_v12  ;;  %3609 = vmatprep.mubr.msk.f32.mxu0 %vm4058_vm1, %v4059_v4 }
 0x60c   :  { %3880 = vmatprep.subr.bf16.mxu0 %v4057_v0 }
 0x60f   :  { %3882 = vmatpush3.bf16.msra.mxu0 %v4118_v18 }
 0x610   :  { %3883 = vmatprep.subr.bf16.mxu0 %v4057_v0 }
 0x6dd   :  { %v1555_v46 = vpop.f32.mrb[2].mxu0 }
 0x6de   :  { %v3951_v47 = vadd.f32 %v1555_v46, %v4182_v41  ;;  %v3534_v48 = vpop.f32.mrb[3].mxu0 }
 0x6df   :  { %v2109_v48 = vld [vmem:[%s4443_s0 + $0x4] sm:$0x1] }
 0x6e0   :  { %1567 = vrot.lane.b32.xlu1 %v3951_v47, %s4060_s25  ;;  %v1559_v50 = vadd.f32 %v3951_v47, %v1071_v49 }
 0x6e2   :  { %v3153_v51 = vmul.f32 -1.442695, %v1559_v50 }
 0x6e4   :  { %4033 = vpow2.f32 %v3153_v51 }
 0x6ee   :  { %v4034_v52 = vpop.eup %4033 }
 0x6ef   :  { %v1563_v53 = vadd.f32 1.0, %v4034_v52 }
 0x6f1   :  { %4035 = vrcp.f32 %v1563_v53 }
 0x6fb   :  { %v4036_v54 = vpop.eup %4035 }
 0x6fc   :  { %v1577_v60 = vsub.f32 1.0, %v4036_v54  ;;  %v1583_v62 = vmul.f32 %v4036_v54, %v4245_v31 }
 0x752   :  { %v1568_v55 = vpop.permute.xlu1 %1567 }
 0x753   :  { %v1570_v56 = vmul.f32 %v4036_v54, %v1568_v55 }
 0x755   :  { %1572 = vrot.lane.b32.xlu0 %v1570_v56, %s4060_s25 }
 0x7c7   :  { %v1573_v57 = vpop.permute.xlu0 %1572 }
 0x7c8   :  { %v1575_v58 = vadd.f32 %v1573_v57, %v1071_v49 }
 0x7ca   :  { %4037 = vtanh.f32 %v1575_v58 }
 0x7d4   :  { %v4038_v59 = vpop.eup %4037 }
 0x7d5   :  { %1579 = vrot.lane.b32.xlu1 %v4038_v59, %s4061_s3 }
 0x847   :  { %v1580_v61 = vpop.permute.xlu1 %1579 }
 0x848   :  { %v1582_v63 = vmul.f32 %v1580_v61, %v1577_v60 }
 0x84a   :  { %v4298_v1 = vadd.f32 %v1583_v62, %v1582_v63 }
 0x84c   :  { %1586 = vrot.lane.b32.xlu0 %v4298_v1, %s4061_s3 }
 0x8be   :  { %v1587_v2 = vpop.permute.xlu0 %1586 }
 0x8bf   :  { %1589 = vst.msk [vmem:[%s4444_s4 + $0x2] sm:$0x1] %vm550_vm2, %v1587_v2  ;;  %v1591_v3 = vsel %vm24_vm0, %v1587_v2, 0 }
 0x8c0   :  { %v1662_v5 = vand.u32 4294901760, %v1591_v3 }
 0x8c2   :  { %v1663_v6 = vsub.f32 %v1591_v3, %v1662_v5 }
 0x8c4   :  { %v1664_v7 = vand.u32 4294901760, %v1663_v6 }
 0x8c6   :  { %v1665_v8 = vsub.f32 %v1663_v6, %v1664_v7 }
 0x8c8   :  { %v1666_v9 = vand.u32 4294901760, %v1665_v8 }
 0x8ca   :  { %3544 = vmatmul.mubr.f32.vlgmr.msra.gmra.mrb[2].mxu1 %v1666_v9 }
 0x8cb   :  { %3849 = vmatpush3.bf16.msra.mxu1 %v4128_v35  ;;  %3554 = vmatprep.mubr.msk.f32.mxu1 %vm4058_vm1, %v4059_v4 }
 0x8cc   :  { %3850 = vmatprep.subr.bf16.mxu1 %v4057_v0 }
 0x8cf   :  { %3852 = vmatpush3.bf16.msra.mxu1 %v4131_v36 }
 0x8d0   :  { %3853 = vmatprep.subr.bf16.mxu1 %v4057_v0 }
 0x8d2   :  { %3555 = vmatmul.mubr.f32.vlgmr.msra.gmra.mrb[2].mxu1 %v1662_v5 }
 0x8d3   :  { %3855 = vmatpush3.bf16.msra.mxu1 %v4137_v37  ;;  %3565 = vmatprep.mubr.msk.f32.mxu1 %vm4058_vm1, %v4059_v4 }
 0x8d4   :  { %3856 = vmatprep.subr.bf16.mxu1 %v4057_v0 }
 0x8d7   :  { %3858 = vmatpush3.bf16.msra.mxu1 %v4142_v38 }
 0x8d8   :  { %3859 = vmatprep.subr.bf16.mxu1 %v4057_v0 }
 0x8da   :  { %3566 = vmatmul.mubr.f32.vlgmr.msra.gmra.mrb[2].mxu1 %v1663_v6 }
 0x8db   :  { %3861 = vmatpush3.bf16.msra.mxu1 %v4113_v12  ;;  %3576 = vmatprep.mubr.msk.f32.mxu1 %vm4058_vm1, %v4059_v4 }
 0x8dc   :  { %3862 = vmatprep.subr.bf16.mxu1 %v4057_v0 }
 0x8df   :  { %3864 = vmatpush3.bf16.msra.mxu1 %v4118_v18 }
 0x8e0   :  { %3865 = vmatprep.subr.bf16.mxu1 %v4057_v0 }
 0x8e2   :  { %3577 = vmatmul.mubr.f32.vlgmr.msra.gmra.mrb[2].mxu1 %v1664_v7 }
 0x8e3   :  { %3867 = vmatpush3.bf16.msra.mxu1 %v4154_v39  ;;  %3587 = vmatprep.mubr.msk.f32.mxu1 %vm4058_vm1, %v4059_v4 }
 0x8e4   :  { %3868 = vmatprep.subr.bf16.mxu1 %v4057_v0 }
 0x8e7   :  { %3870 = vmatpush3.bf16.msra.mxu1 %v4158_v40 }
 0x8e8   :  { %3871 = vmatprep.subr.bf16.mxu1 %v4057_v0 }
 0x8ea   :  { %3588 = vmatmul.mubr.f32.vlgmr.msra.gmra.mrb[2].mxu1 %v1662_v5 }
 0x8eb   :  { %3873 = vmatpush3.bf16.msra.mxu1 %v4113_v12  ;;  %3598 = vmatprep.mubr.msk.f32.mxu1 %vm4058_vm1, %v4059_v4 }
 0x8ec   :  { %3874 = vmatprep.subr.bf16.mxu1 %v4057_v0 }
 0x8ef   :  { %3876 = vmatpush3.bf16.msra.mxu1 %v4118_v18 }
 0x8f0   :  { %3913 = vmatprep.subr.bf16.mxu1 %v4057_v0 }
 0x8f2   :  { %3599 = vmatmul.mubr.f32.vlgmr.msra.gmra.mrb[2].mxu1 %v1662_v5 }
 0x8f3   :  { %3915 = vmatpush3.bf16.msra.mxu1 %v4113_v12  ;;  %3675 = vmatprep.mubr.msk.f32.mxu1 %vm4058_vm1, %v4059_v4 }
 0x8f4   :  { %3916 = vmatprep.subr.bf16.mxu1 %v4057_v0 }
 0x8f7   :  { %3918 = vmatpush3.bf16.msra.mxu1 %v4118_v18 }
 0x8f8   :  { %3919 = vmatprep.subr.bf16.mxu1 %v4057_v0 }
 0x9c5   :  { %v2074_v10 = vpop.f32.mrb[2].mxu1 }
 0x9c6   :  { %v3952_v11 = vadd.f32 %v2074_v10, %v4182_v41  ;;  %v3600_v13 = vpop.f32.mrb[3].mxu1 }
 0x9c8   :  { %2086 = vrot.lane.b32.xlu1 %v3952_v11, %s4060_s25  ;;  %v2078_v15 = vadd.f32 %v3952_v11, %v1590_v14 }
 0x9ca   :  { %v3154_v16 = vmul.f32 -1.442695, %v2078_v15 }
 0x9cc   :  { %4039 = vpow2.f32 %v3154_v16 }
 0x9d6   :  { %v4040_v17 = vpop.eup %4039 }
 0x9d7   :  { %v2082_v19 = vadd.f32 1.0, %v4040_v17 }
 0x9d9   :  { %4041 = vrcp.f32 %v2082_v19 }
 0x9e3   :  { %v4042_v20 = vpop.eup %4041 }
 0x9e4   :  { %v2096_v26 = vsub.f32 1.0, %v4042_v20  ;;  %v2102_v28 = vmul.f32 %v4042_v20, %v4298_v1 }
 0xa3a   :  { %v2087_v21 = vpop.permute.xlu1 %2086 }
 0xa3b   :  { %v2089_v22 = vmul.f32 %v4042_v20, %v2087_v21 }
 0xa3d   :  { %2091 = vrot.lane.b32.xlu0 %v2089_v22, %s4060_s25 }
 0xaaf   :  { %v2092_v23 = vpop.permute.xlu0 %2091 }
 0xab0   :  { %v2094_v24 = vadd.f32 %v2092_v23, %v1590_v14 }
 0xab2   :  { %4043 = vtanh.f32 %v2094_v24 }
 0xabc   :  { %v4044_v25 = vpop.eup %4043 }
 0xabd   :  { %2098 = vrot.lane.b32.xlu1 %v4044_v25, %s4061_s3 }
 0xb2f   :  { %v2099_v27 = vpop.permute.xlu1 %2098 }
 0xb30   :  { %v2101_v29 = vmul.f32 %v2099_v27, %v2096_v26 }
 0xb32   :  { %v2103_v30 = vadd.f32 %v2102_v28, %v2101_v29 }
 0xb34   :  { %2105 = vrot.lane.b32.xlu0 %v2103_v30, %s4061_s3 }
 0xba6   :  { %v2106_v31 = vpop.permute.xlu0 %2105 }
 0xba7   :  { %2108 = vst.msk [vmem:[%s4444_s4 + $0x3] sm:$0x1] %vm550_vm2, %v2106_v31  ;;  %v2110_v32 = vsel %vm24_vm0, %v2106_v31, 0 }
 0xba8   :  { %v2181_v33 = vand.u32 4294901760, %v2110_v32 }
 0xbaa   :  { %v2182_v34 = vsub.f32 %v2110_v32, %v2181_v33 }
 0xbac   :  { %v2183_v42 = vand.u32 4294901760, %v2182_v34 }
 0xbae   :  { %v2184_v43 = vsub.f32 %v2182_v34, %v2183_v42 }
 0xbb0   :  { %v2185_v44 = vand.u32 4294901760, %v2184_v43 }
 0xbb2   :  { %3610 = vmatmul.mubr.f32.vlgmr.msra.gmra.mrb[4].mxu0 %v2185_v44 }
 0xbb3   :  { %3885 = vmatpush3.bf16.msra.mxu0 %v4128_v35  ;;  %3620 = vmatprep.mubr.msk.f32.mxu0 %vm4058_vm1, %v4059_v4 }
 0xbb4   :  { %3886 = vmatprep.subr.bf16.mxu0 %v4057_v0 }
 0xbb7   :  { %3888 = vmatpush3.bf16.msra.mxu0 %v4131_v36 }
 0xbb8   :  { %3889 = vmatprep.subr.bf16.mxu0 %v4057_v0 }
 0xbba   :  { %3621 = vmatmul.mubr.f32.vlgmr.msra.gmra.mrb[4].mxu0 %v2181_v33 }
 0xbbb   :  { %3891 = vmatpush3.bf16.msra.mxu0 %v4137_v37  ;;  %3631 = vmatprep.mubr.msk.f32.mxu0 %vm4058_vm1, %v4059_v4 }
 0xbbc   :  { %3892 = vmatprep.subr.bf16.mxu0 %v4057_v0 }
 0xbbf   :  { %3894 = vmatpush3.bf16.msra.mxu0 %v4142_v38 }
 0xbc0   :  { %3895 = vmatprep.subr.bf16.mxu0 %v4057_v0 }
 0xbc2   :  { %3632 = vmatmul.mubr.f32.vlgmr.msra.gmra.mrb[4].mxu0 %v2182_v34 }
 0xbc3   :  { %3897 = vmatpush3.bf16.msra.mxu0 %v4113_v12  ;;  %3642 = vmatprep.mubr.msk.f32.mxu0 %vm4058_vm1, %v4059_v4 }
 0xbc4   :  { %3898 = vmatprep.subr.bf16.mxu0 %v4057_v0 }
 0xbc7   :  { %3900 = vmatpush3.bf16.msra.mxu0 %v4118_v18 }
 0xbc8   :  { %3901 = vmatprep.subr.bf16.mxu0 %v4057_v0 }
 0xbca   :  { %3643 = vmatmul.mubr.f32.vlgmr.msra.gmra.mrb[4].mxu0 %v2183_v42 }
 0xbcb   :  { %3903 = vmatpush3.bf16.msra.mxu0 %v4154_v39  ;;  %3653 = vmatprep.mubr.msk.f32.mxu0 %vm4058_vm1, %v4059_v4 }
 0xbcc   :  { %3904 = vmatprep.subr.bf16.mxu0 %v4057_v0 }
 0xbcf   :  { %3906 = vmatpush3.bf16.msra.mxu0 %v4158_v40 }
 0xbd0   :  { %3907 = vmatprep.subr.bf16.mxu0 %v4057_v0 }
 0xbd2   :  { %3654 = vmatmul.mubr.f32.vlgmr.msra.gmra.mrb[4].mxu0 %v2181_v33 }
 0xbd3   :  { %3909 = vmatpush3.bf16.msra.mxu0 %v4113_v12  ;;  %3664 = vmatprep.mubr.msk.f32.mxu0 %vm4058_vm1, %v4059_v4 }
 0xbd4   :  { %3910 = vmatprep.subr.bf16.mxu0 %v4057_v0 }
 0xbd7   :  { %3912 = vmatpush3.bf16.msra.mxu0 %v4118_v18 }
 0xbda   :  { %3665 = vmatmul.mubr.f32.vlgmr.msra.gmra.mrb[4].mxu0 %v2181_v33 }
 0xcad   :  { %v2593_v45 = vpop.f32.mrb[4].mxu0 }
 0xcae   :  { %v3953_v46 = vadd.f32 %v2593_v45, %v4182_v41  ;;  %v3666_v47 = vpop.f32.mrb[5].mxu0 }
 0xcb0   :  { %2605 = vrot.lane.b32.xlu1 %v3953_v46, %s4060_s25  ;;  %v2597_v49 = vadd.f32 %v3953_v46, %v2109_v48 }
 0xcb2   :  { %v3155_v50 = vmul.f32 -1.442695, %v2597_v49 }
 0xcb4   :  { %4045 = vpow2.f32 %v3155_v50 }
 0xcbe   :  { %v4046_v51 = vpop.eup %4045 }
 0xcbf   :  { %v2601_v52 = vadd.f32 1.0, %v4046_v51 }
 0xcc1   :  { %4047 = vrcp.f32 %v2601_v52 }
 0xccb   :  { %v4048_v53 = vpop.eup %4047 }
 0xccc   :  { %v2615_v59 = vsub.f32 1.0, %v4048_v53  ;;  %v2621_v61 = vmul.f32 %v4048_v53, %v2103_v30 }
 0xd22   :  { %v2606_v54 = vpop.permute.xlu1 %2605 }
 0xd23   :  { %v2608_v55 = vmul.f32 %v4048_v53, %v2606_v54 }
 0xd25   :  { %2610 = vrot.lane.b32.xlu0 %v2608_v55, %s4060_s25 }
 0xd97   :  { %v2611_v56 = vpop.permute.xlu0 %2610 }
 0xd98   :  { %v2613_v57 = vadd.f32 %v2611_v56, %v2109_v48 }
 0xd9a   :  { %4049 = vtanh.f32 %v2613_v57 }
 0xda4   :  { %v4050_v58 = vpop.eup %4049 }
 0xda5   :  { %2617 = vrot.lane.b32.xlu1 %v4050_v58, %s4061_s3 }
 0xe17   :  { %v2618_v60 = vpop.permute.xlu1 %2617 }
 0xe18   :  { %v2620_v62 = vmul.f32 %v2618_v60, %v2615_v59 }
 0xe1a   :  { %v2622_v63 = vadd.f32 %v2621_v61, %v2620_v62 }
 0xe1c   :  { %2624 = vrot.lane.b32.xlu0 %v2622_v63, %s4061_s3 }
 0xe8e   :  { %v2625_v1 = vpop.permute.xlu0 %2624 }
 0xe8f   :  { %2627 = vst.msk [vmem:[%s4444_s4 + $0x4] sm:$0x1] %vm550_vm2, %v2625_v1  ;;  %v2629_v2 = vsel %vm24_vm0, %v2625_v1, 0 }
 0xe90   :  { %v2700_v3 = vand.u32 4294901760, %v2629_v2 }
 0xe92   :  { %v2701_v5 = vsub.f32 %v2629_v2, %v2700_v3 }
 0xe94   :  { %v2702_v6 = vand.u32 4294901760, %v2701_v5 }
 0xe96   :  { %v2703_v7 = vsub.f32 %v2701_v5, %v2702_v6 }
 0xe98   :  { %v2704_v8 = vand.u32 4294901760, %v2703_v7 }
 0xe9a   :  { %3676 = vmatmul.mubr.f32.vlgmr.msra.gmra.mrb[4].mxu1 %v2704_v8 }
 0xe9b   :  { %3921 = vmatpush3.bf16.msra.mxu1 %v4128_v35  ;;  %3686 = vmatprep.mubr.msk.f32.mxu1 %vm4058_vm1, %v4059_v4 }
 0xe9c   :  { %3922 = vmatprep.subr.bf16.mxu1 %v4057_v0 }
 0xe9f   :  { %3924 = vmatpush3.bf16.msra.mxu1 %v4131_v36 }
 0xea0   :  { %3925 = vmatprep.subr.bf16.mxu1 %v4057_v0 }
 0xea2   :  { %3687 = vmatmul.mubr.f32.vlgmr.msra.gmra.mrb[4].mxu1 %v2700_v3 }
 0xea3   :  { %3927 = vmatpush3.bf16.msra.mxu1 %v4137_v37  ;;  %3697 = vmatprep.mubr.msk.f32.mxu1 %vm4058_vm1, %v4059_v4 }
 0xea4   :  { %3928 = vmatprep.subr.bf16.mxu1 %v4057_v0 }
 0xea7   :  { %3930 = vmatpush3.bf16.msra.mxu1 %v4142_v38  ;;  %v2628_v38 = vld [vmem:[%s4443_s0 + $0x5] sm:$0x1] }
 0xea8   :  { %3931 = vmatprep.subr.bf16.mxu1 %v4057_v0 }
 0xeaa   :  { %3698 = vmatmul.mubr.f32.vlgmr.msra.gmra.mrb[4].mxu1 %v2701_v5 }
 0xeab   :  { %3933 = vmatpush3.bf16.msra.mxu1 %v4113_v12  ;;  %3708 = vmatprep.mubr.msk.f32.mxu1 %vm4058_vm1, %v4059_v4 }
 0xeac   :  { %3934 = vmatprep.subr.bf16.mxu1 %v4057_v0 }
 0xeaf   :  { %3936 = vmatpush3.bf16.msra.mxu1 %v4118_v18 }
 0xeb0   :  { %3937 = vmatprep.subr.bf16.mxu1 %v4057_v0 }
 0xeb2   :  { %3709 = vmatmul.mubr.f32.vlgmr.msra.gmra.mrb[4].mxu1 %v2702_v6 }
 0xeb3   :  { %3939 = vmatpush3.bf16.msra.mxu1 %v4154_v39  ;;  %3719 = vmatprep.mubr.msk.f32.mxu1 %vm4058_vm1, %v4059_v4 }
 0xeb4   :  { %3940 = vmatprep.subr.bf16.mxu1 %v4057_v0 }
 0xeb7   :  { %3942 = vmatpush3.bf16.msra.mxu1 %v4158_v40 }
 0xeb8   :  { %3943 = vmatprep.subr.bf16.mxu1 %v4057_v0 }
 0xeba   :  { %3720 = vmatmul.mubr.f32.vlgmr.msra.gmra.mrb[4].mxu1 %v2700_v3 }
 0xebb   :  { %3945 = vmatpush3.bf16.msra.mxu1 %v4113_v12  ;;  %3730 = vmatprep.mubr.msk.f32.mxu1 %vm4058_vm1, %v4059_v4 }
 0xebc   :  { %3946 = vmatprep.subr.bf16.mxu1 %v4057_v0 }
 0xebf   :  { %3948 = vmatpush3.bf16.msra.mxu1 %v4118_v18 }
 0xec2   :  { %3731 = vmatmul.mubr.f32.vlgmr.msra.gmra.mrb[4].mxu1 %v2700_v3 }
 0xf95   :  { %v3112_v35 = vpop.f32.mrb[4].mxu1 }
 0xf96   :  { %v3954_v36 = vadd.f32 %v3112_v35, %v4182_v41  ;;  %v3732_v37 = vpop.f32.mrb[5].mxu1 }
 0xf98   :  { %3124 = vrot.lane.b32.xlu1 %v3954_v36, %s4060_s25  ;;  %v3116_v39 = vadd.f32 %v3954_v36, %v2628_v38 }
 0xf9a   :  { %v3156_v12 = vmul.f32 -1.442695, %v3116_v39 }
 0xf9c   :  { %4051 = vpow2.f32 %v3156_v12 }
 0xfa6   :  { %v4052_v40 = vpop.eup %4051 }
 0xfa7   :  { %v3120_v4 = vadd.f32 1.0, %v4052_v40 }
 0xfa9   :  { %4053 = vrcp.f32 %v3120_v4 }
 0xfb3   :  { %v4054_v0 = vpop.eup %4053 }
 0xfb4   :  { %v3134_v13 = vsub.f32 1.0, %v4054_v0  ;;  %v3140_v15 = vmul.f32 %v4054_v0, %v2622_v63 }
0x100a   :  { %v3125_v9 = vpop.permute.xlu1 %3124 }
0x100b   :  { %v3127_v18 = vmul.f32 %v4054_v0, %v3125_v9 }
0x100d   :  { %3129 = vrot.lane.b32.xlu0 %v3127_v18, %s4060_s25 }
0x107f   :  { %v3130_v10 = vpop.permute.xlu0 %3129 }
0x1080   :  { %v3132_v41 = vadd.f32 %v3130_v10, %v2628_v38 }
0x1082   :  { %4055 = vtanh.f32 %v3132_v41 }
0x108c   :  { %v4056_v11 = vpop.eup %4055 }
0x108d   :  { %3136 = vrot.lane.b32.xlu1 %v4056_v11, %s4061_s3 }
0x10ff   :  { %v3137_v14 = vpop.permute.xlu1 %3136 }
0x1100   :  { %v3139_v16 = vmul.f32 %v3137_v14, %v3134_v13 }
0x1102   :  { %v3141_v17 = vadd.f32 %v3140_v15, %v3139_v16 }
0x1104   :  { %3143 = vrot.lane.b32.xlu0 %v3141_v17, %s4061_s3 }
0x1176   :  { %v3144_v19 = vpop.permute.xlu0 %3143 }
0x1177   :  { %3146 = vst.msk [vmem:[%s4444_s4 + $0x5] sm:$0x1] %vm550_vm2, %v3144_v19 }

</bundles_post_ra>
